<compile_context>
chip_gen: v5e
topology: v5e:2x2
jax: 0.10.0
libtpu: 0.0.40
codegen_flags: <defaults>
</compile_context>

<pallas_src>
import jax
import jax.numpy as jnp
from jax.experimental import pallas as pl
from jax.experimental.pallas import tpu as pltpu


# ----------------------------- kernel ---------------------------------------


def _final_layer_kernel(mod_ref, x_ref, w_ref, b_ref, out_ref):
    # mod_ref: (2, H) fp32 -- row 0 = shift, row 1 = (scale + 1), per batch
    # x_ref:   (tT, H)     -- token tile (input dtype)
    # w_ref:   (H, O)      -- linear weight, pre-transposed at setup time
    # b_ref:   (1, O) fp32 -- linear bias
    # out_ref: (tT, O)
    x = x_ref[...].astype(jnp.float32)                  # LN stats in fp32
    xc = x - jnp.mean(x, axis=-1, keepdims=True)        # center once, reuse
    var = jnp.mean(xc * xc, axis=-1, keepdims=True)
    x_norm = xc * jax.lax.rsqrt(var + 1e-6)             # fp32, no affine

    # Modulation in fp32 (v5e VPU has no bf16 ALU); exactly one cast before dot.
    shift = mod_ref[0:1, :]                              # (1, H) fp32
    scale1 = mod_ref[1:2, :]                             # (1, H) fp32, "+1" folded in
    y = (x_norm * scale1 + shift).astype(w_ref.dtype)    # (tT, H)

    out = jnp.dot(y, w_ref[...], preferred_element_type=jnp.float32)  # (tT, O)
    out = out + b_ref[...]                                            # fp32 bias
    out_ref[...] = out.astype(out_ref.dtype)


# ----------------------------- wrapper ---------------------------------------


def prepare_final_layer_params(w_lin, b_lin, dtype):
    """One-time parameter setup (NOT per forward): transpose weight to (H, O),
    keep bias in fp32."""
    w_lin_t = jnp.asarray(w_lin.T, dtype=dtype)               # (H, O)
    b_lin_f32 = jnp.asarray(b_lin, jnp.float32).reshape(1, -1)  # (1, O)
    return w_lin_t, b_lin_f32


def _vmem_limit_bytes():
    # Generation-aware VMEM limit: ~80% of physical per-TC VMEM
    # (~51 MiB on v7x's 64 MiB, ~102 MiB on v5e/v6e's 128 MiB).
    try:
        cap = pltpu.get_tpu_info().vmem_capacity_bytes
        return int(cap * 0.8)
    except Exception:
        return 48 * 1024 * 1024  # conservative fallback, safe on every gen


def _choose_token_tile(B, T, H, O, dtype_bytes, vmem_limit, block_t):
    """Pick the token tile: as big as possible (amortize per-step overhead on
    this HBM-bound layer) while fitting the VMEM budget and leaving enough grid
    steps for dual-TC pipelining."""
    tT = min(block_t, T)
    if tT >= T:
        return T  # full-extent block, always legal
    budget = int(vmem_limit * 0.7)  # headroom for Mosaic internal scratch

    def footprint(t):
        return (2 * t * H * dtype_bytes       # double-buffered x tile
                + 3 * t * H * 4               # fp32 LN temporaries (x, xc, norm)
                + 2 * t * O * dtype_bytes     # double-buffered output tile
                + t * O * 4                   # fp32 matmul accumulator
                + H * O * dtype_bytes + O * 4)  # resident weight + bias

    while tT > 128 and footprint(tT) > budget:
        tT //= 2
    # v7x megacore: keep >= ~8 grid steps so both TCs pipeline and the first
    # x DMA isn't fully exposed.
    while tT > 128 and B * pl.cdiv(T, tT) < 8:
        tT //= 2
    return tT


def final_layer(x, c, w_ada, b_ada, w_lin_t, b_lin_f32, *, block_t=1024):
    """x: (B, T, H); c: (B, H); w_ada: (2H, H) [torch layout]; b_ada: (2H,);
    w_lin_t: (H, O) pre-transposed; b_lin_f32: (1, O) fp32."""
    B, T, H = x.shape
    O = w_lin_t.shape[1]

    # --- adaLN modulation hoisted out of the kernel (tiny (B, 2H) matmul) ---
    ada = (jax.nn.silu(c.astype(jnp.float32))
           @ w_ada.T.astype(jnp.float32) + b_ada.astype(jnp.float32))  # (B, 2H)
    shift = ada[:, :H]
    scale1 = ada[:, H:] + 1.0
    mod = jnp.stack([shift, scale1], axis=1)                 # (B, 2, H), fp32

    # --- token tiling / VMEM budgeting ---
    dtype_bytes = jnp.dtype(x.dtype).itemsize
    vmem_limit = _vmem_limit_bytes()
    tT = _choose_token_tile(B, T, H, O, dtype_bytes, vmem_limit, block_t)
    nT = pl.cdiv(T, tT)
    # If T % tT != 0 the last x tile carries extra rows; their results are
    # discarded on writeback (harmless wasted work), output stays correct.

    grid_spec = pltpu.PrefetchScalarGridSpec(
        num_scalar_prefetch=0,
        grid=(B, nT),
        in_specs=[
            pl.BlockSpec((pl.Squeezed(), 2, H), lambda b, t: (b, 0, 0)),   # shift/scale+1
            pl.BlockSpec((pl.Squeezed(), tT, H), lambda b, t: (b, t, 0)),  # x tile
            pl.BlockSpec((H, O), lambda b, t: (0, 0)),                     # w_lin (resident)
            pl.BlockSpec((1, O), lambda b, t: (0, 0)),                     # b_lin (fp32)
        ],
        # Direct (B, T, O) output — no O padding, no wrapper slice pass.
        # TODO(synk): for very small O, a consumer that accepts an O_pad=128
        # lane-dense slab (indexing it itself) would make the stores unmasked.
        out_specs=pl.BlockSpec((pl.Squeezed(), tT, O), lambda b, t: (b, t, 0)),
    )

    out = pl.pallas_call(
        _final_layer_kernel,
        out_shape=jax.ShapeDtypeStruct((B, T, O), x.dtype),
        grid_spec=grid_spec,
        compiler_params=pltpu.CompilerParams(
            dimension_semantics=("parallel", "parallel"),
            vmem_limit_bytes=vmem_limit),
    )(mod, x, w_lin_t, b_lin_f32)

    return out


# ----------------------------- reference --------------------------------------


def final_layer_ref(x, c, w_ada, b_ada, w_lin, b_lin):
    """Pure-JAX reference matching the PyTorch forward."""
    H = x.shape[-1]
    c_act = c * jax.nn.sigmoid(c)
    ada = c_act @ w_ada.T + b_ada
    shift, scale = ada[:, :H], ada[:, H:]
    xf = x.astype(jnp.float32)
    mean = jnp.mean(xf, axis=-1, keepdims=True)
    var = jnp.mean((xf - mean) ** 2, axis=-1, keepdims=True)
    xn = ((xf - mean) / jnp.sqrt(var + 1e-6)).astype(x.dtype)
    y = xn * (scale[:, None, :] + 1.0) + shift[:, None, :]
    return (y @ w_lin.T + b_lin).astype(x.dtype)


if __name__ == "__main__":
    B, T, H = 2, 8, 32          # batch, tokens, hidden_size
    num_patch, out_channels = 4, 8
    O = num_patch * out_channels

    key = jax.random.PRNGKey(0)
    k_x, k_c, k_wa, k_ba, k_wl, k_bl = jax.random.split(key, 6)

    x = jax.random.normal(k_x, (B, T, H), dtype=jnp.float32)
    c = jax.random.normal(k_c, (B, H), dtype=jnp.float32)
    # Deterministic synthetic parameters (torch Linear weight layouts).
    w_ada = jax.random.normal(k_wa, (2 * H, H), dtype=jnp.float32) * 0.05
    b_ada = jax.random.normal(k_ba, (2 * H,), dtype=jnp.float32) * 0.05
    w_lin = jax.random.normal(k_wl, (O, H), dtype=jnp.float32) * 0.05
    b_lin = jax.random.normal(k_bl, (O,), dtype=jnp.float32) * 0.05

    # One-time parameter preparation (would live at module init in a real model).
    w_lin_t, b_lin_f32 = prepare_final_layer_params(w_lin, b_lin, x.dtype)

    out = final_layer(x, c, w_ada, b_ada, w_lin_t, b_lin_f32)
    out = jax.block_until_ready(out)

    ref = final_layer_ref(x, c, w_ada, b_ada, w_lin, b_lin)
    assert out.shape == (B, T, O)
    assert jnp.allclose(out, ref, atol=1e-4, rtol=1e-4)

    print("KERNEL_OK")
</pallas_src>

<mosaic_0001>
module attributes {stable_mosaic.version = 11 : i64} {
  func.func @_final_layer_kernel(%arg0: i32, %arg1: i32, %arg2: memref<1x2x32xf32, #tpu.memory_space<vmem>>, %arg3: memref<1x8x32xf32, #tpu.memory_space<vmem>>, %arg4: memref<32x32xf32, #tpu.memory_space<vmem>>, %arg5: memref<1x32xf32, #tpu.memory_space<vmem>>, %arg6: memref<1x8x32xf32, #tpu.memory_space<vmem>>) attributes {dimension_semantics = [#tpu.dimension_semantics<parallel>, #tpu.dimension_semantics<parallel>], iteration_bounds = array<i64: 2, 1>, scalar_prefetch = 0 : i64, scratch_operands = 0 : i64, tpu.core_type = #tpu.core_type<tc>, window_params = [{transform_indices = @transform_0, window_bounds = array<i64: 1, 2, 32>}, {transform_indices = @transform_1, window_bounds = array<i64: 1, 8, 32>}, {pipeline_mode = #tpu.pipeline_mode<synchronous>, transform_indices = @transform_2, window_bounds = array<i64: 32, 32>}, {pipeline_mode = #tpu.pipeline_mode<synchronous>, transform_indices = @transform_3, window_bounds = array<i64: 1, 32>}, {transform_indices = @transform_4, window_bounds = array<i64: 1, 8, 32>}]} {
    %c0 = arith.constant 0 : index
    %c0_0 = arith.constant 0 : index
    %c0_1 = arith.constant 0 : index
    %0 = vector.load %arg3[%c0, %c0_0, %c0_1] : memref<1x8x32xf32, #tpu.memory_space<vmem>>, vector<1x8x32xf32>
    %1 = vector.shape_cast %0 : vector<1x8x32xf32> to vector<8x32xf32>
    %cst = arith.constant dense<0.000000e+00> : vector<8xf32>
    %2 = vector.multi_reduction <add>, %1, %cst [1] : vector<8x32xf32> to vector<8xf32>
    %3 = vector.shape_cast %2 : vector<8xf32> to vector<8x1xf32>
    %cst_2 = arith.constant 3.200000e+01 : f32
    %4 = vector.broadcast %cst_2 : f32 to vector<8x1xf32>
    %5 = arith.divf %3, %4 : vector<8x1xf32>
    %6 = vector.broadcast %5 : vector<8x1xf32> to vector<8x32xf32>
    %7 = arith.subf %1, %6 : vector<8x32xf32>
    %8 = arith.mulf %7, %7 : vector<8x32xf32>
    %cst_3 = arith.constant dense<0.000000e+00> : vector<8xf32>
    %9 = vector.multi_reduction <add>, %8, %cst_3 [1] : vector<8x32xf32> to vector<8xf32>
    %10 = vector.shape_cast %9 : vector<8xf32> to vector<8x1xf32>
    %cst_4 = arith.constant 3.200000e+01 : f32
    %11 = vector.broadcast %cst_4 : f32 to vector<8x1xf32>
    %12 = arith.divf %10, %11 : vector<8x1xf32>
    %cst_5 = arith.constant 9.99999997E-7 : f32
    %13 = vector.broadcast %cst_5 : f32 to vector<8x1xf32>
    %14 = arith.addf %12, %13 : vector<8x1xf32>
    %15 = math.rsqrt %14 : vector<8x1xf32>
    %16 = vector.broadcast %15 : vector<8x1xf32> to vector<8x32xf32>
    %17 = arith.mulf %7, %16 : vector<8x32xf32>
    %c0_6 = arith.constant 0 : index
    %c0_7 = arith.constant 0 : index
    %c0_8 = arith.constant 0 : index
    %18 = vector.load %arg2[%c0_6, %c0_7, %c0_8] : memref<1x2x32xf32, #tpu.memory_space<vmem>>, vector<1x1x32xf32>
    %19 = vector.shape_cast %18 : vector<1x1x32xf32> to vector<1x32xf32>
    %c0_9 = arith.constant 0 : index
    %c1 = arith.constant 1 : index
    %c0_10 = arith.constant 0 : index
    %20 = vector.load %arg2[%c0_9, %c1, %c0_10] : memref<1x2x32xf32, #tpu.memory_space<vmem>>, vector<1x1x32xf32>
    %21 = vector.shape_cast %20 : vector<1x1x32xf32> to vector<1x32xf32>
    %22 = vector.broadcast %21 : vector<1x32xf32> to vector<8x32xf32>
    %23 = arith.mulf %17, %22 : vector<8x32xf32>
    %24 = vector.broadcast %19 : vector<1x32xf32> to vector<8x32xf32>
    %25 = arith.addf %23, %24 : vector<8x32xf32>
    %c0_11 = arith.constant 0 : index
    %c0_12 = arith.constant 0 : index
    %26 = vector.load %arg4[%c0_11, %c0_12] : memref<32x32xf32, #tpu.memory_space<vmem>>, vector<32x32xf32>
    %cst_13 = arith.constant dense<0.000000e+00> : vector<8x32xf32>
    %27 = tpu.matmul %25, %26, %cst_13 {dimension_numbers = #tpu.dot_dimension_numbers<[1], [0], [0], [1], [0, 0, 1, 1], [], []>} : vector<8x32xf32>, vector<32x32xf32>, vector<8x32xf32> -> vector<8x32xf32>
    %c0_14 = arith.constant 0 : index
    %c0_15 = arith.constant 0 : index
    %28 = vector.load %arg5[%c0_14, %c0_15] : memref<1x32xf32, #tpu.memory_space<vmem>>, vector<1x32xf32>
    %29 = vector.broadcast %28 : vector<1x32xf32> to vector<8x32xf32>
    %30 = arith.addf %27, %29 : vector<8x32xf32>
    %c0_16 = arith.constant 0 : index
    %c0_17 = arith.constant 0 : index
    %c0_18 = arith.constant 0 : index
    %31 = vector.load %arg6[%c0_16, %c0_17, %c0_18] : memref<1x8x32xf32, #tpu.memory_space<vmem>>, vector<1x8x32xf32>
    %32 = vector.shape_cast %31 : vector<1x8x32xf32> to vector<8x32xf32>
    %33 = vector.shape_cast %30 : vector<8x32xf32> to vector<1x8x32xf32>
    tpu.vector_store %arg6[%c0_16, %c0_17, %c0_18], %33 {strides = array<i32>} : memref<1x8x32xf32, #tpu.memory_space<vmem>>, vector<1x8x32xf32>,
    return
  }
  func.func @transform_0(%arg0: i32, %arg1: i32) -> (i32, i32, i32) {
    %c0_i32 = arith.constant 0 : i32
    %c0_i32_0 = arith.constant 0 : i32
    %c0_i32_1 = arith.constant 0 : i32
    return %arg0, %c0_i32, %c0_i32_0 : i32, i32, i32
  }
  func.func @transform_1(%arg0: i32, %arg1: i32) -> (i32, i32, i32) {
    %c0_i32 = arith.constant 0 : i32
    %c0_i32_0 = arith.constant 0 : i32
    return %arg0, %arg1, %c0_i32 : i32, i32, i32
  }
  func.func @transform_2(%arg0: i32, %arg1: i32) -> (i32, i32) {
    %c0_i32 = arith.constant 0 : i32
    %c0_i32_0 = arith.constant 0 : i32
    %c0_i32_1 = arith.constant 0 : i32
    return %c0_i32, %c0_i32_0 : i32, i32
  }
  func.func @transform_3(%arg0: i32, %arg1: i32) -> (i32, i32) {
    %c0_i32 = arith.constant 0 : i32
    %c0_i32_0 = arith.constant 0 : i32
    %c0_i32_1 = arith.constant 0 : i32
    return %c0_i32, %c0_i32_0 : i32, i32
  }
  func.func @transform_4(%arg0: i32, %arg1: i32) -> (i32, i32, i32) {
    %c0_i32 = arith.constant 0 : i32
    %c0_i32_0 = arith.constant 0 : i32
    return %arg0, %arg1, %c0_i32 : i32, i32, i32
  }
}

</mosaic_0001>

<bundles_post_ra>
// kernel: tpu_custom_call.1
= control target key start
LH: loop header
LB: loop body
LE: loop exit
PB: predicated region body
PF: predicated region fallthrough
CT: control target
= control target key end

     0   :  { %s972_s0 = inlined_call_operand.hbm [shape: f32[2,2,32], index: 0, kind: input, shape index: {}]   ;;  %s973_s1 = inlined_call_operand.hbm [shape: f32[2,8,32], index: 1, kind: input, shape index: {}]   ;;  %s974_s2 = inlined_call_operand.hbm [shape: f32[32,32], index: 2, kind: input, shape index: {}]   ;;  %s975_s3 = inlined_call_operand.vmem [shape: f32[1,32], index: 3, kind: input, shape index: {}]   ;;  %s976_s4 = inlined_call_operand.hbm [shape: f32[2,8,32], index: 4, kind: output, shape index: {}]  }
   0x1   :  { %981 = sst [smem:[#allocation18_spill]] %s974_s2 }
   0x2   :  { %9 = vsyncpa [#allocation3], 0 }
   0x3   :  { %11 = vsyncpa [#allocation3 + $0x1], 0 }
   0x4   :  { %12 = vsyncpa [#allocation6], 0 }
   0x5   :  { %14 = vsyncpa [#allocation6 + $0x1], 0 }
   0x6   :  { %15 = vsyncpa [#allocation4], 0 }
   0x7   :  { %17 = vsyncpa [#allocation4 + $0x1], 0  ;;  %s803_s15 = smov 0   ;;  %s805_s16 = smov 0  }
   0x8   :  { %s807_s17 = smov 0   ;;  %s809_s18 = smov 0  }
   0x9   :  { %s811_s19 = smov 0   ;;  %s813_s20 = smov 0  }
   0xa LB: > { %982 = sst [smem:[#allocation13_spill]] %s752_s15  ;;  %s834_s21 = sadd.s32 4294967295, %s772_s20   ;;  %s772_s20 = sphi %s813_s20, %s23_s20   ;;  %s768_s19 = sphi %s811_s19, %s1002_s19   ;;  %s764_s18 = sphi %s809_s18, %s1001_s18   ;;  %s760_s17 = sphi %s807_s17, %s1000_s17   ;;  %s756_s16 = sphi %s805_s16, %s999_s16   ;;  %s752_s15 = sphi %s803_s15, %s998_s15  }
   0xb   : > { %983 = sst [smem:[#allocation14_spill]] %s760_s17  ;;  %p487_p0 = scmp.ge.s32.totalorder %s772_s20, 1 }
   0xc   : > { %p56_p1 = scmp.eq.s32.totalorder %s834_s21, 0  ;;  %p164_p2 = scmp.lt.s32.totalorder %s772_s20, 3 }
   0xd   : > { %s984_s2 = sld [smem:[#allocation18_spill]]  ;;  %s774_s26 = smov [#allocation7]  }
   0xe   : > { %p842_p3 = pnand %p487_p0, %p164_p2  ;;  %s177_s27 = sshll.u32 %s774_s26, 4  ;;  %s178_s27 = int_to_ptr.vmem [resolvable:$true] %s177_s27 }
   0xf   : > { %p489_p6 = scmp.ge.s32.totalorder %s772_s20, 2  ;;  %s775_s28 = smov 128  }
  0x10   : > { %p514_p4 = pneg %p842_p3  ;;  %s776_s29 = smov 8  }
  0x11   : > { %s486_s30 = sadd.s32 4294967294, %s772_s20   ;;  %s35_s5 = sadd.s32 1, %s768_s19 }
  0x12   : > { %p515_p5 = pnand %p514_p4, %p56_p1  ;;  %s42_s6 = sadd.s32 1, %s760_s17 }
  0x13   : > { %s175_s24 = sshll.u32 %s984_s2, 4  ;;  %p37_p7 = scmp.ge.s32.totalorder %s35_s5, 2  ;;  %s176_s24 = int_to_ptr.hbm [resolvable:$true] %s175_s24 }
  0x14   : > { %517 = dma.hbm_to_vmem [thread:$0]  (!%p515_p5), %s176_s24, 512, %s178_s27, [#allocation6], %s775_s28, %s775_s28, %s776_s29  }
  0x15   : > { %p49_p8 = scmp.ne.s32.totalorder %s760_s17, %s756_s16  ;;  %p50_p9 = scmp.eq.s32.totalorder %s772_s20, 0 }
  0x16   : > { %p55_p10 = scmp.ne.s32.totalorder %s756_s16, %s752_s15  ;;  %s1004_s5 = smov (%p37_p7, %s35_s5), 0 }
  0x17   : > { %986 = sst [smem:[#allocation15_spill]] %s1004_s5  ;;  %p861_p11 = por %p50_p9, %p49_p8 }
  0x18   : > { %p867_p12 = por %p56_p1, %p55_p10  ;;  %s39_s9 = ssub.s32 %s768_s19, %s1004_s5 }
  0x19   : > { %p151_p13 = scmp.eq.s32.totalorder %s834_s21, 1  ;;  %p40_p0 = scmp.eq.s32.totalorder %s39_s9, 0 }
  0x1a   : > { %p157_p2 = scmp.eq.s32.totalorder %s486_s30, 1  ;;  %p530_p5 = scmp.lt.s32.totalorder %s772_s20, 2 }
  0x1b   : > { %p874_p4 = por %p151_p13, %p49_p8  ;;  %s194_s13 = sand.u32 1, %s760_s17  }
  0x1c   : > { %s880_s11 = scalar_select %p40_p0, %s760_s17, %s42_s6  }
  0x1d   : > { %p882_p7 = por %p157_p2, %p55_p10  ;;  %s490_s14 = sshll.u32 %s194_s13, 1 }
  0x1e   : > { %990 = sst [smem:[#allocation16_spill]] %s880_s11  ;;  %s491_s22 = sshll.u32 %s768_s19, 1 }
  0x1f   : > { %s991_s12 = scalar_select %p882_p7, 1, 0 }
  0x20   : > { %s202_s26 = scalar_lea.hbm %s972_s0, %s491_s22  ;;  %s198_s27 = scalar_lea.vmem [#allocation2], %s490_s14 }
  0x21   : > { %992 = sst [smem:[#allocation17_spill]] %s991_s12  ;;  %s206_s28 = sshll.u32 %s198_s27, 4  ;;  %s207_s28 = int_to_ptr.vmem [resolvable:$true] %s206_s28 }
  0x22   : > { %s204_s29 = sshll.u32 %s202_s26, 4  ;;  %p519_p8 = pnand %p530_p5, %p861_p11  ;;  %s205_s29 = int_to_ptr.hbm [resolvable:$true] %s204_s29 }
  0x23   : > { %s213_s30 = sand.u32 1, %s772_s20   ;;  %s492_s6 = sshll.u32 %s194_s13, 3 }
  0x24   : > { %s195_s9 = scalar_lea.sflag [#allocation3], %s194_s13  ;;  %s493_s2 = sshll.u32 %s768_s19, 3 }
  0x25   : > { %521 = dma.hbm_to_vmem [thread:$0]  (!%p519_p8), %s205_s29, 32, %s207_s28, %s195_s9  }
  0x26   : > { %s222_s17 = scalar_lea.hbm %s973_s1, %s493_s2  ;;  %s217_s12 = scalar_lea.vmem [#allocation5], %s492_s6 }
  0x27   : > { %s226_s15 = sshll.u32 %s217_s12, 4  ;;  %s224_s23 = sshll.u32 %s222_s17, 4  ;;  %s227_s15 = int_to_ptr.vmem [resolvable:$true] %s226_s15  ;;  %s225_s23 = int_to_ptr.hbm [resolvable:$true] %s224_s23 }
  0x28   : > { %s214_s14 = scalar_lea.sflag [#allocation6], %s213_s30  ;;  %235 = sbr.rel (%p842_p3) target bundleno = 451 (0x1c3), region = 36 }
  0x29   : > { %524 = dma.hbm_to_vmem [thread:$0]  (!%p519_p8), %s225_s23, 128, %s227_s15, %s214_s14  }
  0x2a   : > { %s901_s7 = sand.u32 (!%p842_p3), 1, %s756_s16  }
  0x2b   : > { %s495_s13 = sshll.u32 (!%p842_p3), %s901_s7, 1  ;;  %s238_s22 = scalar_lea.sflag (!%p842_p3), [#allocation3], %s901_s7 }
  0x2c   : > { %s905_s5 = scalar_lea.vmem (!%p842_p3), [#allocation2], %s495_s13 }
  0x2d   : > { %735 = dma.done.wait (%p867_p12), %s238_s22, 32  }
  0x2e   : > { %737 = vsyncadd (%p867_p12), %s238_s22, 4294967264  ;;  %s247_s2 = sand.u32 1, %s834_s21   ;;  %s496_s15 = sshll.u32 %s901_s7, 3 }
  0x2f   : > { %s248_s17 = scalar_lea.sflag [#allocation6], %s247_s2  ;;  %s251_s25 = scalar_lea.vmem [#allocation5], %s496_s15 }
  0x30   : > { %739 = dma.done.wait (%p867_p12), %s248_s17, 128  }
  0x31   : > { %741 = vsyncadd (%p867_p12), %s248_s17, 4294967168 }
  0x32   : > { %743 = dma.done.wait (%p56_p1), [#allocation6], 512  }
  0x33   : > { %745 = vsyncadd (%p56_p1), [#allocation6], 4294966784  ;;  %vm288_vm0 = vcmask 261120   ;;  %v287_v0 = vld [vmem:[%s251_s25] sm:$0xff]  ;;  %v777_v2 = vmov 32.0   ;;  %v325_v16 = vld [vmem:[#allocation7 + $0x8] sm:$0xff] }
  0x34   : > { %v289_v1 = vsel %vm288_vm0, %v287_v0, 0.0  ;;  %588 = vrcp.f32 %v777_v2  ;;  %v327_v14 = vld [vmem:[#allocation7 + $0x18] sm:$0xff]  ;;  %v326_v15 = vld [vmem:[#allocation7 + $0x10] sm:$0xff]  ;;  %v324_v17 = vld [vmem:[#allocation7] sm:$0xff]  ;;  %s501_s21 = sshll.u32 %s764_s18, 3  ;;  %s286_s27 = scalar_lea.vmem [#allocation8], %s496_s15 }
  0x35   : > { %290 = vadd.xlane.f32.xlu0 %v289_v1  ;;  %347 = vmatpush.msra.mxu0 %v327_v14  ;;  %v585_v27 = vld [vmem:[%s905_s5 + $0x1] ss:$0 sm:$0xff]  ;;  %v586_v30 = vld [vmem:[%s905_s5] ss:$0 sm:$0xff]  ;;  %s368_s12 = scalar_lea.hbm %s976_s4, %s501_s21  ;;  %s370_s28 = sshll.u32 %s286_s27, 4  ;;  %s371_s28 = int_to_ptr.vmem [resolvable:$true] %s370_s28 }
  0x36   : > { %v587_v33 = vld [vmem:[%s975_s3] ss:$0 sm:$0xff]  ;;  %s372_s29 = sshll.u32 %s368_s12, 4  ;;  %s357_s18 = scalar_lea.sflag [#allocation4], %s901_s7  ;;  %s373_s29 = int_to_ptr.hbm [resolvable:$true] %s372_s29 }
  0x37   : > { %348 = vmatpush.msra.mxu0 %v326_v15  ;;  %s696_s30 = sshra.s32 %s373_s29, 4  ;;  %s702_s14 = scalar_lea.hbm %s976_s4, 16  ;;  %s697_s30 = int_to_ptr.hbm [resolvable:$true] %s696_s30 }
  0x38   : > { %s698_s6 = scalar_lea.hbm %s697_s30, 8  ;;  %p703_p10 = scmp.lt.s32.totalorder %s697_s30, %s976_s4 }
  0x39   : > { %349 = vmatpush.msra.mxu0 %v325_v16  ;;  %p699_p1 = scmp.ne.s32.totalorder %s697_s30, %s698_s6  ;;  %p704_p11 = scmp.lt.s32.totalorder %s702_s14, %s698_s6 }
  0x3a   : > { %v589_v3 = vpop.eup %588 }
  0x3b   : > { %v293_v4 = vmul.f32 32.0, %v589_v3  ;;  %vm297_vm1 = vweird.f32 %v589_v3  ;;  %350 = vmatpush.msra.mxu0 %v324_v17  ;;  %p700_p3 = pnand %p699_p1, %p874_p4  ;;  %p705_p12 = por %p704_p11, %p703_p10 }
  0x3d   : > { %v294_v5 = vsub.f32 1.0, %v293_v4  ;;  %p701_p9 = pneg %p700_p3 }
  0x3f   : > { %v295_v6 = vmul.f32 %v589_v3, %v294_v5  ;;  %p706_p13 = pnand %p705_p12, %p701_p9 }
  0x41   : > { %v296_v7 = vadd.f32 %v589_v3, %v295_v6 }
  0x43   : > { %v298_v8 = vsel %vm297_vm1, %v589_v3, %v296_v7 }
  0xa8   : > { %v291_v9 = vpop.xlane.xlu0 %290 }
  0xa9   : > { %v299_v10 = vmul.f32 %v298_v8, %v291_v9 }
  0xab   : > { %v300_v11 = vsub.f32 %v287_v0, %v299_v10 }
  0xad   : > { %v301_v12 = vmul.f32 %v300_v11, %v300_v11 }
  0xaf   : > { %v302_v13 = vsel %vm288_vm0, %v301_v12, 0.0 }
  0xb0   : > { %303 = vadd.xlane.f32.xlu0 %v302_v13 }
 0x123   : > { %v304_v18 = vpop.xlane.xlu0 %303 }
 0x124   : > { %v305_v19 = vmul.f32 %v304_v18, %v298_v8 }
 0x126   : > { %v306_v20 = vadd.f32 1e-06, %v305_v19 }
 0x128   : > { %590 = vrsqrt.f32 %v306_v20  ;;  %vm313_vm3 = vweird.f32 %v306_v20 }
 0x12e   : > { %v591_v21 = vpop.eup %590 }
 0x12f   : > { %v308_v22 = vmul.f32 %v591_v21, %v306_v20  ;;  %vm314_vm2 = vweird.f32 %v591_v21 }
 0x130   : > { %vm315_vm4 = vmor %vm313_vm3, %vm314_vm2 }
 0x131   : > { %v309_v23 = vmul.f32 %v591_v21, %v308_v22 }
 0x133   : > { %v310_v24 = vmul.f32 0.5, %v309_v23 }
 0x135   : > { %v311_v25 = vsub.f32 1.5, %v310_v24 }
 0x137   : > { %v312_v26 = vmul.f32 %v591_v21, %v311_v25 }
 0x139   : > { %v316_v28 = vsel %vm315_vm4, %v591_v21, %v312_v26 }
 0x13a   : > { %v317_v29 = vmul.f32 %v316_v28, %v300_v11 }
 0x13c   : > { %v321_v31 = vmul.f32 %v585_v27, %v317_v29 }
 0x13e   : > { %v323_v32 = vadd.f32 %v586_v30, %v321_v31 }
 0x140   : > { %499 = vmatmul.msk.f32.vlgmr.msra.gmra.mxu0 %vm288_vm0, %v323_v32 }
 0x1bd   : > { %v352_v34 = vpop.f32.mrf.mxu0 }
 0x1be   : > { %v353_v35 = vadd.f32 %v587_v33, %v352_v34 }
 0x1c0   : > { %355 = vst.msk [vmem:[%s286_s27] sm:$0xff] %vm288_vm0, %v353_v35 }
 0x1c1   : > { %709 = shalt.err (!%p706_p13)
}
 0x1c2   : > { %512 = dma.vmem_to_hbm [thread:$0]  (%p874_p4), %s371_s28, 128, %s373_s29, %s357_s18  }
 0x1c3 PF: > { %s993_s7 = sld [smem:[#allocation13_spill]]  ;;  %p526_p0 = pnand %p489_p6, %p882_p7 }
 0x1c5   : > { %p527_p2 = pneg %p526_p0 }
 0x1c9   : > { %s384_s2 = sand.u32 1, %s993_s7  }
 0x1ca   : > { %s385_s15 = scalar_lea.sflag [#allocation4], %s384_s2 }
 0x1cb   : > { %747 = dma.done.wait (%p527_p2), %s385_s15, 128  }
 0x1cc   : > { %749 = vsyncadd (%p527_p2), %s385_s15, 4294967168  ;;  %s23_s20 = sadd.s32 1, %s772_s20   ;;  %s995_s17 = sld [smem:[#allocation14_spill]] }
 0x1cd   : > { %p20_p5 = scmp.ge.s32.totalorder %s23_s20, 4   ;;  %s996_s25 = sld [smem:[#allocation16_spill]] }
 0x1ce   : > { %s997_s10 = sld [smem:[#allocation15_spill]]  ;;  %s998_s15 = smov %s756_s16 }
 0x1cf   : > { %s1001_s18 = smov %s768_s19 }
 0x1d0   :  { %22 = sbr.rel (!%p20_p5) target bundleno = 10 (0xa), region = 98 }
 0x1d2   : > { %s999_s16 = smov %s995_s17 }
 0x1d3   : > { %s1000_s17 = smov %s996_s25 }
 0x1d4   : > { %s1002_s19 = smov %s997_s10 }
 0x1d5   :  { %391 = vsyncpa [#allocation3], 1 }
 0x1d6   :  { %393 = vsyncpa [#allocation3 + $0x1], 1 }
 0x1d7   :  { %394 = vsyncpa [#allocation6], 1 }
 0x1d8   :  { %396 = vsyncpa [#allocation6 + $0x1], 1 }
 0x1d9   :  { %397 = vsyncpa [#allocation4], 1 }
 0x1da   :  { %399 = vsyncpa [#allocation4 + $0x1], 1 }

</bundles_post_ra>
